<compile_context>
chip_gen: v7x
topology: tpu7x:2x2x1
jax: 0.10.0
libtpu: 0.0.40
codegen_flags: <defaults>
</compile_context>

<pallas_src>
import functools

import jax
import jax.numpy as jnp
from jax.experimental import pallas as pl
from jax.experimental.pallas import tpu as pltpu


LANE = 128                      # TPU lane width (last-dim alignment)
TM_DEFAULT = 32768              # batch-tile size (lanes per grid step)
VMEM_LIMIT_BYTES = 32 * 1024 * 1024


def mlp_kernel(x_ref,              # (2, TM)   f32, batch on lanes
               w1_ref, b1_ref,     # (16, 2) f32, (16, 1) f32
               w2_ref, b2_ref,     # (32, 16) cd,  (32, 1) f32
               w3_ref, b3_ref,     # (32, 32) cd,  (32, 1) f32
               w4_ref, b4_ref,     # (1, 32) cd  [MXU path]  or  (32, 1) f32 [VPU path]
               o_ref,              # (1, TM)   f32
               *, compute_dtype, out_on_mxu):
    x = x_ref[...]

    # Layer 1 (K=2): two broadcast FMAs on the VPU, f32, then one cast post-ReLU.
    h = w1_ref[:, 0:1] * x[0:1, :] + w1_ref[:, 1:2] * x[1:2, :] + b1_ref[...]
    h = jnp.maximum(h, 0.0).astype(compute_dtype)                      # (16, TM)

    # Layers 2-3: MXU matmuls (bf16 inputs by default), f32 accumulation, f32 bias/ReLU,
    # activations re-cast to compute_dtype to halve VMEM round-trip traffic.
    h = jnp.dot(w2_ref[...], h, preferred_element_type=jnp.float32) + b2_ref[...]
    h = jnp.maximum(h, 0.0).astype(compute_dtype)                      # (32, TM)

    h = jnp.dot(w3_ref[...], h, preferred_element_type=jnp.float32) + b3_ref[...]
    h = jnp.maximum(h, 0.0).astype(compute_dtype)                      # (32, TM)

    # Layer 4 (N=1): MXU in the bf16 path (MXU has slack there); VPU mul + XLU reduce
    # in the f32 path (where the MXU is the binding unit).
    if out_on_mxu:
        o_ref[...] = (jnp.dot(w4_ref[...], h, preferred_element_type=jnp.float32)
                      + b4_ref[...])
    else:
        o_ref[...] = (jnp.sum(w4_ref[...] * h.astype(jnp.float32),
                              axis=0, keepdims=True) + b4_ref[...])


def mlp_forward(x, params, *, tm=TM_DEFAULT, compute_dtype=jnp.bfloat16):
    """x: (N, 2) float32. params: torch-layout weights w_i:(out,in), biases b_i:(out,1)."""
    n = x.shape[0]
    compute_dtype = jnp.dtype(compute_dtype)
    out_on_mxu = compute_dtype != jnp.dtype(jnp.float32)

    # Lane-dense layout: batch on the lane axis, padded to a lane-aligned multiple.
    n_pad = max(LANE, pl.cdiv(n, LANE) * LANE)
    # Cap tm so (a) it never exceeds the padded batch and (b) the grid has >= 2 steps
    # whenever possible, so the "parallel" axis can shard across v7x's two TensorCores.
    tm = max(LANE, min(tm, n_pad, (n_pad // (2 * LANE)) * LANE))
    n_pad = pl.cdiv(n_pad, tm) * tm
    grid = (n_pad // tm,)

    # Pad only the tail of x.T (single pass over the input outside the kernel).
    xt = x.T.astype(jnp.float32)
    if n_pad > n:
        xt = jnp.pad(xt, ((0, 0), (0, n_pad - n)))

    w1, b1 = params["w1"], params["b1"]
    w2, b2 = params["w2"].astype(compute_dtype), params["b2"]
    w3, b3 = params["w3"].astype(compute_dtype), params["b3"]
    b4 = params["b4"]
    if out_on_mxu:
        w4 = params["w4"].astype(compute_dtype)      # (1, 32): row-vector MXU matmul
    else:
        w4 = params["w4"].T                          # (32, 1): VPU multiply + XLU reduce

    resident = lambda a: pl.BlockSpec(a.shape, lambda i: (0,) * a.ndim)
    in_specs = [pl.BlockSpec((2, tm), lambda i: (0, i)),
                resident(w1), resident(b1),
                resident(w2), resident(b2),
                resident(w3), resident(b3),
                resident(w4), resident(b4)]
    out_specs = pl.BlockSpec((1, tm), lambda i: (0, i))

    param_bytes = sum(int(p.size) * p.dtype.itemsize
                      for p in (w1, b1, w2, b2, w3, b3, w4, b4))
    # Truthful HBM bytes: the (2,N) input and (1,N) output f32 slabs are sublane-padded
    # to 8 rows in the tiled HBM layout, so the DMAs move 8*n_pad*4 bytes each way.
    io_bytes = 2 * (8 * n_pad * 4)
    cost = pl.CostEstimate(
        flops=2 * n_pad * (2 * 16 + 16 * 32 + 32 * 32 + 32 * 1),
        transcendentals=0,
        bytes_accessed=io_bytes + param_bytes,
    )

    kernel = functools.partial(mlp_kernel, compute_dtype=compute_dtype,
                               out_on_mxu=out_on_mxu)

    out_t = pl.pallas_call(
        kernel,
        out_shape=jax.ShapeDtypeStruct((1, n_pad), jnp.float32),
        grid=grid,
        in_specs=in_specs,
        out_specs=out_specs,
        compiler_params=pltpu.CompilerParams(
            dimension_semantics=("parallel",),
            vmem_limit_bytes=VMEM_LIMIT_BYTES),
        cost_estimate=cost,
    )(xt, w1, b1, w2, b2, w3, b3, w4, b4)

    return out_t[:, :n].T                                              # (N, 1) f32


# ----------------------------- init / reference -----------------------------

def xavier_uniform(key, fan_in, fan_out):
    # torch.nn.init.xavier_uniform_ (gain=1): U(-a, a), a = sqrt(6/(fan_in+fan_out)).
    # Torch weight layout is (out, in); keep it that way (kernel computes W @ act).
    a = jnp.sqrt(6.0 / (fan_in + fan_out))
    return jax.random.uniform(key, (fan_out, fan_in), jnp.float32, minval=-a, maxval=a)


def linear_bias_init(key, fan_in, fan_out):
    # torch.nn.Linear default bias init: U(-1/sqrt(fan_in), 1/sqrt(fan_in)).
    bound = 1.0 / jnp.sqrt(float(fan_in))
    return jax.random.uniform(key, (fan_out, 1), jnp.float32, minval=-bound, maxval=bound)


def init_params(key):
    keys = jax.random.split(key, 8)
    dims = [(2, 16), (16, 32), (32, 32), (32, 1)]
    params = {}
    for i, (fi, fo) in enumerate(dims, start=1):
        params[f"w{i}"] = xavier_uniform(keys[2 * (i - 1)], fi, fo)
        params[f"b{i}"] = linear_bias_init(keys[2 * (i - 1) + 1], fi, fo)
    return params


def reference_forward(x, params):
    h = x
    for i in (1, 2, 3):
        h = jnp.maximum(h @ params[f"w{i}"].T + params[f"b{i}"].T, 0.0)
    return h @ params["w4"].T + params["b4"].T


if __name__ == "__main__":
    key = jax.random.PRNGKey(0)
    pkey, xkey, xkey2 = jax.random.split(key, 3)
    params = init_params(pkey)

    # Small case, default (bf16-MXU) path, single grid step.
    batch = 8
    x = jax.random.normal(xkey, (batch, 2), jnp.float32)
    out = jax.block_until_ready(mlp_forward(x, params))
    ref = reference_forward(x, params)
    assert out.shape == (batch, 1), out.shape
    assert jnp.allclose(out, ref, atol=5e-2, rtol=5e-2), (out, ref)

    # Multi-step batch grid (tm=128 -> 3 grid steps), default bf16 path.
    batch2 = 300
    x2 = jax.random.normal(xkey2, (batch2, 2), jnp.float32)
    out2 = jax.block_until_ready(mlp_forward(x2, params, tm=128))
    ref2 = reference_forward(x2, params)
    assert out2.shape == (batch2, 1), out2.shape
    assert jnp.allclose(out2, ref2, atol=5e-2, rtol=5e-2)

    # f32 path (exercises the VPU-multiply + XLU-reduce output head) — exact-math check.
    out3 = jax.block_until_ready(
        mlp_forward(x2, params, tm=128, compute_dtype=jnp.float32))
    assert out3.shape == (batch2, 1), out3.shape
    assert jnp.allclose(out3, ref2, atol=1e-4, rtol=1e-4)

    print("KERNEL_OK")
</pallas_src>

<mosaic_0001>
module attributes {stable_mosaic.version = 11 : i64} {
  func.func @mlp_kernel(%arg0: i32, %arg1: memref<2x128xf32, #tpu.memory_space<vmem>>, %arg2: memref<16x2xf32, #tpu.memory_space<vmem>>, %arg3: memref<16x1xf32, #tpu.memory_space<vmem>>, %arg4: memref<32x16xbf16, #tpu.memory_space<vmem>>, %arg5: memref<32x1xf32, #tpu.memory_space<vmem>>, %arg6: memref<32x32xbf16, #tpu.memory_space<vmem>>, %arg7: memref<32x1xf32, #tpu.memory_space<vmem>>, %arg8: memref<1x32xbf16, #tpu.memory_space<vmem>>, %arg9: memref<1x1xf32, #tpu.memory_space<vmem>>, %arg10: memref<1x128xf32, #tpu.memory_space<vmem>>) attributes {dimension_semantics = [#tpu.dimension_semantics<parallel>], iteration_bounds = array<i64: 1>, scalar_prefetch = 0 : i64, scratch_operands = 0 : i64, tpu.core_type = #tpu.core_type<tc>, window_params = [{transform_indices = @transform_0, window_bounds = array<i64: 2, 128>}, {pipeline_mode = #tpu.pipeline_mode<synchronous>, transform_indices = @transform_1, window_bounds = array<i64: 16, 2>}, {pipeline_mode = #tpu.pipeline_mode<synchronous>, transform_indices = @transform_2, window_bounds = array<i64: 16, 1>}, {pipeline_mode = #tpu.pipeline_mode<synchronous>, transform_indices = @transform_3, window_bounds = array<i64: 32, 16>}, {pipeline_mode = #tpu.pipeline_mode<synchronous>, transform_indices = @transform_4, window_bounds = array<i64: 32, 1>}, {pipeline_mode = #tpu.pipeline_mode<synchronous>, transform_indices = @transform_5, window_bounds = array<i64: 32, 32>}, {pipeline_mode = #tpu.pipeline_mode<synchronous>, transform_indices = @transform_6, window_bounds = array<i64: 32, 1>}, {pipeline_mode = #tpu.pipeline_mode<synchronous>, transform_indices = @transform_7, window_bounds = array<i64: 1, 32>}, {pipeline_mode = #tpu.pipeline_mode<synchronous>, transform_indices = @transform_8, window_bounds = array<i64: 1, 1>}, {transform_indices = @transform_9, window_bounds = array<i64: 1, 128>}]} {
    %c0 = arith.constant 0 : index
    %c0_0 = arith.constant 0 : index
    %0 = vector.load %arg1[%c0, %c0_0] : memref<2x128xf32, #tpu.memory_space<vmem>>, vector<2x128xf32>
    %c0_1 = arith.constant 0 : index
    %c0_2 = arith.constant 0 : index
    %1 = vector.load %arg2[%c0_1, %c0_2] : memref<16x2xf32, #tpu.memory_space<vmem>>, vector<16x1xf32>
    %2 = vector.extract_strided_slice %0 {offsets = [0, 0], sizes = [1, 128], strides = [1, 1]} : vector<2x128xf32> to vector<1x128xf32>
    %3 = vector.broadcast %1 : vector<16x1xf32> to vector<16x128xf32>
    %4 = vector.broadcast %2 : vector<1x128xf32> to vector<16x128xf32>
    %5 = arith.mulf %3, %4 : vector<16x128xf32>
    %c0_3 = arith.constant 0 : index
    %c1 = arith.constant 1 : index
    %6 = vector.load %arg2[%c0_3, %c1] : memref<16x2xf32, #tpu.memory_space<vmem>>, vector<16x1xf32>
    %7 = vector.extract_strided_slice %0 {offsets = [1, 0], sizes = [1, 128], strides = [1, 1]} : vector<2x128xf32> to vector<1x128xf32>
    %8 = vector.broadcast %6 : vector<16x1xf32> to vector<16x128xf32>
    %9 = vector.broadcast %7 : vector<1x128xf32> to vector<16x128xf32>
    %10 = arith.mulf %8, %9 : vector<16x128xf32>
    %11 = arith.addf %5, %10 : vector<16x128xf32>
    %c0_4 = arith.constant 0 : index
    %c0_5 = arith.constant 0 : index
    %12 = vector.load %arg3[%c0_4, %c0_5] : memref<16x1xf32, #tpu.memory_space<vmem>>, vector<16x1xf32>
    %13 = vector.broadcast %12 : vector<16x1xf32> to vector<16x128xf32>
    %14 = arith.addf %11, %13 : vector<16x128xf32>
    %cst = arith.constant 0.000000e+00 : f32
    %15 = vector.broadcast %cst : f32 to vector<16x128xf32>
    %16 = arith.maximumf %14, %15 : vector<16x128xf32>
    %17 = arith.truncf %16 : vector<16x128xf32> to vector<16x128xbf16>
    %c0_6 = arith.constant 0 : index
    %c0_7 = arith.constant 0 : index
    %18 = vector.load %arg4[%c0_6, %c0_7] : memref<32x16xbf16, #tpu.memory_space<vmem>>, vector<32x16xbf16>
    %cst_8 = arith.constant dense<0.000000e+00> : vector<32x128xf32>
    %19 = tpu.matmul %18, %17, %cst_8 {dimension_numbers = #tpu.dot_dimension_numbers<[1], [0], [0], [1], [0, 0, 1, 1], [], []>} : vector<32x16xbf16>, vector<16x128xbf16>, vector<32x128xf32> -> vector<32x128xf32>
    %c0_9 = arith.constant 0 : index
    %c0_10 = arith.constant 0 : index
    %20 = vector.load %arg5[%c0_9, %c0_10] : memref<32x1xf32, #tpu.memory_space<vmem>>, vector<32x1xf32>
    %21 = vector.broadcast %20 : vector<32x1xf32> to vector<32x128xf32>
    %22 = arith.addf %19, %21 : vector<32x128xf32>
    %cst_11 = arith.constant 0.000000e+00 : f32
    %23 = vector.broadcast %cst_11 : f32 to vector<32x128xf32>
    %24 = arith.maximumf %22, %23 : vector<32x128xf32>
    %25 = arith.truncf %24 : vector<32x128xf32> to vector<32x128xbf16>
    %c0_12 = arith.constant 0 : index
    %c0_13 = arith.constant 0 : index
    %26 = vector.load %arg6[%c0_12, %c0_13] : memref<32x32xbf16, #tpu.memory_space<vmem>>, vector<32x32xbf16>
    %cst_14 = arith.constant dense<0.000000e+00> : vector<32x128xf32>
    %27 = tpu.matmul %26, %25, %cst_14 {dimension_numbers = #tpu.dot_dimension_numbers<[1], [0], [0], [1], [0, 0, 1, 1], [], []>} : vector<32x32xbf16>, vector<32x128xbf16>, vector<32x128xf32> -> vector<32x128xf32>
    %c0_15 = arith.constant 0 : index
    %c0_16 = arith.constant 0 : index
    %28 = vector.load %arg7[%c0_15, %c0_16] : memref<32x1xf32, #tpu.memory_space<vmem>>, vector<32x1xf32>
    %29 = vector.broadcast %28 : vector<32x1xf32> to vector<32x128xf32>
    %30 = arith.addf %27, %29 : vector<32x128xf32>
    %cst_17 = arith.constant 0.000000e+00 : f32
    %31 = vector.broadcast %cst_17 : f32 to vector<32x128xf32>
    %32 = arith.maximumf %30, %31 : vector<32x128xf32>
    %33 = arith.truncf %32 : vector<32x128xf32> to vector<32x128xbf16>
    %c0_18 = arith.constant 0 : index
    %c0_19 = arith.constant 0 : index
    %34 = vector.load %arg8[%c0_18, %c0_19] : memref<1x32xbf16, #tpu.memory_space<vmem>>, vector<1x32xbf16>
    %cst_20 = arith.constant dense<0.000000e+00> : vector<1x128xf32>
    %35 = tpu.matmul %34, %33, %cst_20 {dimension_numbers = #tpu.dot_dimension_numbers<[1], [0], [0], [1], [0, 0, 1, 1], [], []>} : vector<1x32xbf16>, vector<32x128xbf16>, vector<1x128xf32> -> vector<1x128xf32>
    %c0_21 = arith.constant 0 : index
    %c0_22 = arith.constant 0 : index
    %36 = vector.load %arg9[%c0_21, %c0_22] : memref<1x1xf32, #tpu.memory_space<vmem>>, vector<1x1xf32>
    %37 = vector.broadcast %36 : vector<1x1xf32> to vector<1x128xf32>
    %38 = arith.addf %35, %37 : vector<1x128xf32>
    %c0_23 = arith.constant 0 : index
    %c0_24 = arith.constant 0 : index
    %39 = vector.load %arg10[%c0_23, %c0_24] : memref<1x128xf32, #tpu.memory_space<vmem>>, vector<1x128xf32>
    tpu.vector_store %arg10[%c0_23, %c0_24], %38 {strides = array<i32>} : memref<1x128xf32, #tpu.memory_space<vmem>>, vector<1x128xf32>,
    return
  }
  func.func @transform_0(%arg0: i32) -> (i32, i32) {
    %c0_i32 = arith.constant 0 : i32
    %c0_i32_0 = arith.constant 0 : i32
    return %c0_i32, %arg0 : i32, i32
  }
  func.func @transform_1(%arg0: i32) -> (i32, i32) {
    %c0_i32 = arith.constant 0 : i32
    %c0_i32_0 = arith.constant 0 : i32
    %c0_i32_1 = arith.constant 0 : i32
    return %c0_i32, %c0_i32_0 : i32, i32
  }
  func.func @transform_2(%arg0: i32) -> (i32, i32) {
    %c0_i32 = arith.constant 0 : i32
    %c0_i32_0 = arith.constant 0 : i32
    %c0_i32_1 = arith.constant 0 : i32
    return %c0_i32, %c0_i32_0 : i32, i32
  }
  func.func @transform_3(%arg0: i32) -> (i32, i32) {
    %c0_i32 = arith.constant 0 : i32
    %c0_i32_0 = arith.constant 0 : i32
    %c0_i32_1 = arith.constant 0 : i32
    return %c0_i32, %c0_i32_0 : i32, i32
  }
  func.func @transform_4(%arg0: i32) -> (i32, i32) {
    %c0_i32 = arith.constant 0 : i32
    %c0_i32_0 = arith.constant 0 : i32
    %c0_i32_1 = arith.constant 0 : i32
    return %c0_i32, %c0_i32_0 : i32, i32
  }
  func.func @transform_5(%arg0: i32) -> (i32, i32) {
    %c0_i32 = arith.constant 0 : i32
    %c0_i32_0 = arith.constant 0 : i32
    %c0_i32_1 = arith.constant 0 : i32
    return %c0_i32, %c0_i32_0 : i32, i32
  }
  func.func @transform_6(%arg0: i32) -> (i32, i32) {
    %c0_i32 = arith.constant 0 : i32
    %c0_i32_0 = arith.constant 0 : i32
    %c0_i32_1 = arith.constant 0 : i32
    return %c0_i32, %c0_i32_0 : i32, i32
  }
  func.func @transform_7(%arg0: i32) -> (i32, i32) {
    %c0_i32 = arith.constant 0 : i32
    %c0_i32_0 = arith.constant 0 : i32
    %c0_i32_1 = arith.constant 0 : i32
    return %c0_i32, %c0_i32_0 : i32, i32
  }
  func.func @transform_8(%arg0: i32) -> (i32, i32) {
    %c0_i32 = arith.constant 0 : i32
    %c0_i32_0 = arith.constant 0 : i32
    %c0_i32_1 = arith.constant 0 : i32
    return %c0_i32, %c0_i32_0 : i32, i32
  }
  func.func @transform_9(%arg0: i32) -> (i32, i32) {
    %c0_i32 = arith.constant 0 : i32
    %c0_i32_0 = arith.constant 0 : i32
    return %c0_i32, %arg0 : i32, i32
  }
}

</mosaic_0001>

<bundles_post_ra>
// kernel: tpu_custom_call.1
= control target key start
LH: loop header
LB: loop body
LE: loop exit
PB: predicated region body
PF: predicated region fallthrough
CT: control target
= control target key end

     0   :  { %s571_s0 = inlined_call_operand.vmem [shape: f32[2,128], index: 0, kind: input, shape index: {}]   ;;  %s572_s1 = inlined_call_operand.vmem [shape: f32[16,2], index: 1, kind: input, shape index: {}]   ;;  %s573_s2 = inlined_call_operand.vmem [shape: f32[16,1], index: 2, kind: input, shape index: {}]   ;;  %s574_s3 = inlined_call_operand.vmem [shape: bf16[32,16], index: 3, kind: input, shape index: {}]   ;;  %s575_s4 = inlined_call_operand.vmem [shape: f32[32,1], index: 4, kind: input, shape index: {}]   ;;  %s576_s5 = inlined_call_operand.vmem [shape: bf16[32,32], index: 5, kind: input, shape index: {}]   ;;  %s577_s6 = inlined_call_operand.vmem [shape: f32[32,1], index: 6, kind: input, shape index: {}]   ;;  %s578_s7 = inlined_call_operand.vmem [shape: bf16[1,32], index: 7, kind: input, shape index: {}]   ;;  %s579_s8 = inlined_call_operand.<no memory space> [shape: f32[1,1], index: 8, kind: input, shape index: {}]   ;;  %s580_s9 = inlined_call_operand.hbm [shape: f32[1,128], index: 9, kind: output, shape index: {}]  }
   0x1   :  { %v14_v0 = vstv %s579_s8 }
   0x2   :  { %15 = vst [vmem:[#allocation2] sm:$0x1] %v14_v0 }
   0x3   :  { %v37_v1 = vld [vmem:[%s572_s1] sm:$0xff]  ;;  %v434_v2 = vmov 1   ;;  %v435_v3 = vmov 0   ;;  %v38_v4 = vld [vmem:[%s572_s1 + $0x8] sm:$0xff] }
   0x4   :  { %404 = vset.pattern.permute.xlu1 %v434_v2  ;;  %403 = vset.pattern.permute.xlu0 %v435_v3  ;;  %v71_v5 = vld [vmem:[%s573_s2] sm:$0xff] }
   0x5   :  { %56 = vperm.xlu1 %404, %v37_v1   ;;  %41 = vperm.xlu0 %403, %v37_v1  }
   0x9   :  { %60 = vperm.xlu1 %404, %v38_v4   ;;  %46 = vperm.xlu0 %403, %v38_v4  }
   0xa   :  { %16 = vsyncpa [#allocation4], 0  ;;  %v72_v6 = vld [vmem:[%s573_s2 + $0x8] sm:$0xff]  ;;  %v92_v7 = vld [vmem:[%s575_s4] sm:$0xff]  ;;  %vm126_vm0 = vcmask 130048   ;;  %v49_v17 = vlaneseq  ;;  %vm226_vm1 = vcmask 261120  }
   0xb   :  { %v93_v8 = vld [vmem:[%s575_s4 + $0x8] sm:$0xff]  ;;  %v94_v9 = vld [vmem:[%s575_s4 + $0x10] sm:$0xff]  ;;  %v95_v10 = vld [vmem:[%s575_s4 + $0x18] sm:$0xff]  ;;  %v436_v62 = vmov 0.0   ;;  %vm437_vm2 = vmmov 0   ;;  %s438_s17 = smov [#allocation3]  }
   0xc   :  { %v406_v11 = vld [vmem:[%s574_s3] sm:$0xff]   ;;  %v193_v13 = vld [vmem:[%s577_s6 + $0x8] sm:$0xff]  ;;  %v194_v14 = vld [vmem:[%s577_s6 + $0x10] sm:$0xff]  ;;  %v532_v18 = vshrl.u32 %v49_v17, 7  ;;  %s349_s18 = sshll.u32 %s438_s17, 4  ;;  %s350_s18 = int_to_ptr.vmem [resolvable:$true] %s349_s18 }
   0xd   :  { %405 = vset.pattern.permute.xlu1 %v435_v3  ;;  %75 = vperm.xlu0 %403, %v71_v5   ;;  %v192_v12 = vld [vmem:[%s577_s6] sm:$0xff]  ;;  %v195_v15 = vld [vmem:[%s577_s6 + $0x18] sm:$0xff]  ;;  %v407_v41 = vld [vmem:[%s574_s3 + $0x8] sm:$0xff]   ;;  %s410_s19 = scalar_lea.vmem %s350_s18, 16  ;;  %s414_s20 = scalar_lea.vmem %s350_s18, 32 }
   0xe   :  { %80 = vperm.xlu1 %405, %v72_v6   ;;  %378 = vmatprep.mubr.msk.bf16.mxu0 %vm126_vm0, %v406_v11  ;;  %v289_v16 = vld [vmem:[#allocation2] sm:$0x1]  ;;  %v65_v19 = vsub.s32 1, %v532_v18  ;;  %v51_v20 = vsub.s32 0, %v532_v18  ;;  %v409_v61 = vld [vmem:[%s576_s5 + $0x8] sm:$0xff]   ;;  %p411_p0 = scmp.ne.s32.totalorder %s350_s18, %s410_s19  ;;  %p415_p1 = scmp.lt.s32.totalorder %s350_s18, %s350_s18 }
   0xf   :  { %v36_v21 = vld [vmem:[%s571_s0] sm:$0x3]  ;;  %p416_p2 = scmp.lt.s32.totalorder %s414_s20, %s410_s19 }
  0x10   :  { %v66_v22 = vrot.slane %v36_v21, %v65_v19  ;;  %v52_v23 = vrot.slane %v36_v21, %v51_v20  ;;  %v408_v42 = vld [vmem:[%s576_s5] sm:$0xff]  }
  0x11   :  { %98 = vperm.xlu0 %403, %v92_v7   ;;  %386 = vmatprep.mubr.msk.bf16.mxu1 %vm226_vm1, %v408_v42  ;;  %v288_v17 = vld [vmem:[%s578_s7] sm:$0x1]  ;;  %p417_p3 = por %p416_p2, %p415_p1 }
  0x12   :  { %103 = vperm.xlu1 %405, %v93_v8  }
  0x13   :  { %p418_p4 = pnand %p417_p3, %p411_p0 }
  0x15   :  { %108 = vperm.xlu0 %403, %v94_v9  }
  0x16   :  { %113 = vperm.xlu1 %405, %v95_v10  }
  0x19   :  { %198 = vperm.xlu0 %403, %v192_v12  }
  0x1a   :  { %203 = vperm.xlu1 %405, %v193_v13  }
  0x1d   :  { %208 = vperm.xlu0 %403, %v194_v14  }
  0x1e   :  { %213 = vperm.xlu1 %405, %v195_v15  }
  0x21   :  { %292 = vperm.xlu0 %403, %v289_v16  }
  0x84   :  { %v57_v24 = vpop.permute.xlu1 %56  ;;  %v42_v25 = vpop.permute.xlu0 %41 }
  0x85   :  { %v67_v26 = vmul.f32 %v66_v22, %v57_v24  ;;  %v53_v27 = vmul.f32 %v52_v23, %v42_v25 }
  0x87   :  { %v69_v32 = vadd.f32 %v67_v26, %v53_v27 }
  0x88   :  { %v61_v28 = vpop.permute.xlu1 %60  ;;  %v47_v29 = vpop.permute.xlu0 %46 }
  0x89   :  { %v68_v30 = vmul.f32 %v66_v22, %v61_v28  ;;  %v54_v31 = vmul.f32 %v52_v23, %v47_v29 }
  0x8b   :  { %v70_v33 = vadd.f32 %v68_v30, %v54_v31 }
  0x8c   :  { %v76_v34 = vpop.permute.xlu0 %75 }
  0x8d   :  { %v83_v35 = vadd.f32 %v76_v34, %v69_v32  ;;  %v81_v36 = vpop.permute.xlu1 %80 }
  0x8e   :  { %v84_v37 = vadd.f32 %v81_v36, %v70_v33 }
  0x8f   :  { %v85_v38 = vmax.f32 %v83_v35, 0.0 }
  0x90   :  { %v86_v39 = vmax.f32 %v84_v37, 0.0  ;;  %v99_v43 = vpop.permute.xlu0 %98 }
  0x91   :  { %v104_v44 = vpop.permute.xlu1 %103 }
  0x92   :  { %v87_v40 = vpack.c.bf16 %v86_v39, %v85_v38 }
  0x94   :  { %376 = vmatprep.subr.bf16.mxu0 %v87_v40  ;;  %v109_v45 = vpop.permute.xlu0 %108 }
  0x95   :  { %377 = vmatpush3.bf16.msra.mxu0 %v87_v40  ;;  %v114_v49 = vpop.permute.xlu1 %113 }
  0x96   :  { %390 = vmatprep.subr.bf16.mxu0 %v436_v62 }
  0x98   :  { %379 = vmatmul.mubr.msk.bf16.vlgmr.msra.gmra.mrb[0].mxu0 %vm126_vm0, %v407_v41  ;;  %v199_v63 = vpop.permute.xlu0 %198 }
  0x99   :  { %394 = vmatprep.mubr.msk.bf16.mxu0 %vm437_vm2, %v436_v62  ;;  %v204_v0 = vpop.permute.xlu1 %203 }
  0x9c   :  { %v209_v1 = vpop.permute.xlu0 %208 }
  0x9d   :  { %v214_v5 = vpop.permute.xlu1 %213 }
  0xa0   :  { %v293_v19 = vpop.permute.xlu0 %292 }
  0xa1   :  { %v298_v21 = vrot.slane %v293_v19, %v51_v20 }
 0x16b   :  { %v380_v46 = vpop.f32.mrb[0].mxu0 }
 0x16c   :  { %v176_v47 = vadd.f32 %v380_v46, %v109_v45  ;;  %v167_v48 = vpop.f32.mrb[1].mxu0 }
 0x16d   :  { %v168_v50 = vadd.f32 %v167_v48, %v99_v43  ;;  %v381_v51 = vpop.f32.mrb[2].mxu0 }
 0x16e   :  { %v179_v52 = vadd.f32 %v381_v51, %v114_v49  ;;  %v170_v53 = vpop.f32.mrb[3].mxu0  ;;  %v184_v55 = vmax.f32 %v176_v47, 0.0 }
 0x16f   :  { %v171_v54 = vadd.f32 %v170_v53, %v104_v44  ;;  %v182_v57 = vmax.f32 %v168_v50, 0.0 }
 0x170   :  { %v185_v56 = vmax.f32 %v179_v52, 0.0 }
 0x171   :  { %v183_v58 = vmax.f32 %v171_v54, 0.0 }
 0x172   :  { %v187_v59 = vpack.c.bf16 %v185_v56, %v184_v55 }
 0x173   :  { %v186_v60 = vpack.c.bf16 %v183_v58, %v182_v57 }
 0x175   :  { %382 = vmatprep.subr.bf16.mxu1 %v186_v60 }
 0x176   :  { %383 = vmatpush3.bf16.msra.mxu1 %v186_v60 }
 0x177   :  { %384 = vmatprep.subr.bf16.mxu1 %v187_v59 }
 0x17a   :  { %385 = vmatpush3.bf16.msra.mxu1 %v187_v59 }
 0x17d   :  { %387 = vmatmul.mubr.msk.bf16.vlgmr.msra.gmra.mrb[0].mxu1 %vm226_vm1, %v409_v61 }
 0x250   :  { %v388_v2 = vpop.f32.mrb[0].mxu1 }
 0x251   :  { %v276_v3 = vadd.f32 %v388_v2, %v209_v1  ;;  %v267_v4 = vpop.f32.mrb[1].mxu1 }
 0x252   :  { %v268_v6 = vadd.f32 %v267_v4, %v199_v63  ;;  %v389_v7 = vpop.f32.mrb[2].mxu1 }
 0x253   :  { %v279_v8 = vadd.f32 %v389_v7, %v214_v5  ;;  %v270_v9 = vpop.f32.mrb[3].mxu1  ;;  %v284_v11 = vmax.f32 %v276_v3, 0.0 }
 0x254   :  { %v271_v10 = vadd.f32 %v270_v9, %v204_v0  ;;  %v282_v13 = vmax.f32 %v268_v6, 0.0 }
 0x255   :  { %v285_v12 = vmax.f32 %v279_v8, 0.0 }
 0x256   :  { %v283_v14 = vmax.f32 %v271_v10, 0.0 }
 0x257   :  { %v287_v15 = vpack.c.bf16 %v285_v12, %v284_v11 }
 0x258   :  { %v286_v16 = vpack.c.bf16 %v283_v14, %v282_v13 }
 0x25a   :  { %391 = vmatpush3.bf16.msra.mxu0 %v286_v16 }
 0x25b   :  { %392 = vmatprep.subr.bf16.mxu0 %v436_v62 }
 0x25e   :  { %393 = vmatpush3.bf16.msra.mxu0 %v287_v15 }
 0x261   :  { %395 = vmatmul.mubr.msk.bf16.vlgmr.msra.gmra.mrb[4].mxu0 %vm226_vm1, %v288_v17 }
 0x334   :  { %v336_v22 = vpop.f32.mrb[4].mxu0 }
 0x335   :  { %v337_v23 = vadd.f32 %v336_v22, %v298_v21  ;;  %v396_v24 = vpop.f32.mrb[5].mxu0 }
 0x336   :  { %v339_v25 = vpop.f32.mrb[6].mxu0 }
 0x337   :  { %342 = vst [vmem:[#allocation3] sm:$0x1] %v337_v23  ;;  %v397_v26 = vpop.f32.mrb[7].mxu0 }
 0x338   :  { %421 = shalt.err (!%p418_p4)
}
 0x339   :  { %s422_s21 = scalar_lea.hbm %s580_s9, 16 }
 0x33a   :  { %p423_p5 = scmp.ne.s32.totalorder %s580_s9, %s422_s21  ;;  %p426_p6 = scmp.lt.u32.totalorder %s422_s21, %s580_s9 }
 0x33c   :  { %p428_p7 = pnand %p426_p6, %p423_p5 }
 0x33e   :  { %431 = shalt.err (!%p428_p7)
}
 0x33f   :  { %352 = dma.vmem_to_hbm [thread:$0]  %s350_s18, 16, %s580_s9, [#allocation4]  }
 0x340   :  { %432 = dma.done.wait [#allocation4], 16  }
 0x341   :  { %433 = vsyncadd [#allocation4], 4294967280 }
 0x342   :  { %356 = vsyncpa [#allocation4], 1 }

</bundles_post_ra>
